<compile_context>
chip_gen: v7x
topology: tpu7x:2x2x1
jax: 0.10.0
libtpu: 0.0.40
codegen_flags: <defaults>
</compile_context>

<pallas_src>
import jax
import jax.numpy as jnp
from jax import lax
from jax.experimental import pallas as pl
from jax.experimental.pallas import tpu as pltpu

_MASK_FILL = -1e32  # AllenNLP masked_softmax fill value (softmax-exact)


def _round_up(x, m):
    return ((x + m - 1) // m) * m


def _cdiv(a, b):
    return -(-a // b)


def _attn_body(q, a, bias_row, ctx_ref, attn_ref):
    """q: (tm, D_att) bf16, a: (L_pad, D_att) bf16, bias_row: (1, L_pad) f32."""
    # logits[i, j] = q[i] . a[j]   (MXU, f32 accumulation, transposed-RHS form)
    logits = lax.dot_general(q, a, (((1,), (1,)), ((), ())),
                             preferred_element_type=jnp.float32)  # (tm, L_pad)
    # Additive mask: 0 = keep, -1e32 = masked token, -inf = lane padding.
    masked = logits + bias_row
    m = jnp.max(masked, axis=-1, keepdims=True)
    e = jnp.exp(masked - m)
    denom = jnp.sum(e, axis=-1, keepdims=True)
    attn = e * (1.0 / denom)                 # exact normalization: rows sum to 1
    ctx = jnp.dot(attn.astype(jnp.bfloat16), a,
                  preferred_element_type=jnp.float32)             # (tm, D_att)
    ctx_ref[0] = ctx.astype(ctx_ref.dtype)
    attn_ref[0] = attn.astype(attn_ref.dtype)


def _kernel_preproj(q_ref, a_ref, bias_ref, ctx_ref, attn_ref):
    _attn_body(q_ref[0], a_ref[0], bias_ref[0], ctx_ref, attn_ref)


def _kernel_with_w(x_ref, w_ref, a_ref, bias_ref, ctx_ref, attn_ref):
    q = jnp.dot(x_ref[0], w_ref[...],
                preferred_element_type=jnp.float32).astype(jnp.bfloat16)
    _attn_body(q, a_ref[0], bias_ref[0], ctx_ref, attn_ref)


def _pick_tm(l_in, l_pad, d_att, budget_bytes):
    # Dominant per-row VMEM: attn-out double buffer (f32) + ~3 live f32
    # (tm, L_pad) softmax slabs + bf16 q row + f32 ctx double buffer.
    bytes_per_row = l_pad * (2 * 4 + 3 * 4) + d_att * (2 * 2 + 2 * 4)
    cap = max(8, budget_bytes // bytes_per_row)
    cap = min((int(cap) // 8) * 8, 1024, _round_up(l_in, 8))
    cap = max(8, cap)
    n_tiles = _cdiv(l_in, cap)
    # Balanced tiles: padding overshoot < 8 rows per tile.
    return _round_up(_cdiv(l_in, n_tiles), 8)


def allennlp_matrix_attention_wrapper(inputs, attend_over, attend_mask, weight,
                                      bias=0.0, *, tm=None,
                                      attn_dtype=jnp.float32,
                                      vmem_limit_bytes=None):
    """
    inputs:      (B, L_in,  D_in)   float32
    attend_over: (B, L_att, D_att)  float32
    attend_mask: (B, L_att)         int (1 = keep, 0 = masked) or None
    weight:      (D_in, D_att)      bilinear attention weight
    bias:        scalar             (softmax-invariant shift -> dropped)
    Returns:
      context:   (B, L_in, D_att)
      attention: (B, L_in, 1, L_att)
    """
    B, L_in, D_in = inputs.shape
    _, L_att, D_att = attend_over.shape
    del bias  # constant logit shift cancels inside softmax (only attn/ctx returned)

    if attend_mask is None:
        attend_mask = jnp.ones((B, L_att), dtype=jnp.int32)

    # ---- bf16 operands & lane-dense attend axis (pad only if needed) --------
    L_pad = _round_up(L_att, 128)
    a_bf = attend_over.astype(jnp.bfloat16)
    if L_pad != L_att:
        a_bf = jnp.pad(a_bf, ((0, 0), (0, L_pad - L_att), (0, 0)))

    # Additive mask bias row: 0 keep / -1e32 masked / -inf lane padding.
    bias_row = jnp.where(attend_mask > 0, jnp.float32(0.0),
                         jnp.float32(_MASK_FILL))
    if L_pad != L_att:
        bias_row = jnp.pad(bias_row, ((0, 0), (0, L_pad - L_att)),
                           constant_values=-jnp.inf)
    bias_row = bias_row.reshape(B, 1, L_pad)

    # ---- tile the input-length axis -----------------------------------------
    work_budget = 36 * 1024 * 1024  # sized against v7x's 64 MiB VMEM
    if tm is None:
        tm = _pick_tm(L_in, L_pad, D_att, work_budget)
    tm = max(8, _round_up(int(tm), 8))
    n_tiles = _cdiv(L_in, tm)
    L_in_pad = tm * n_tiles

    # ---- hoist the query projection into one large XLA bf16 matmul ----------
    preproject = D_att <= D_in
    if preproject:
        q = jnp.einsum("bid,de->bie", inputs.astype(jnp.bfloat16),
                       weight.astype(jnp.bfloat16),
                       preferred_element_type=jnp.float32).astype(jnp.bfloat16)
        D_q, w_bf = D_att, None
    else:
        q = inputs.astype(jnp.bfloat16)
        D_q, w_bf = D_in, weight.astype(jnp.bfloat16)
    if L_in_pad != L_in:
        q = jnp.pad(q, ((0, 0), (0, L_in_pad - L_in), (0, 0)))

    # ---- cost hint for the XLA scheduler -------------------------------------
    attn_itemsize = jnp.dtype(attn_dtype).itemsize
    flops = 2 * 2 * B * L_in_pad * L_pad * D_att            # logits + context
    if not preproject:
        flops += 2 * B * L_in_pad * D_in * D_att
    cost = pl.CostEstimate(
        flops=flops,
        transcendentals=B * L_in_pad * L_pad,
        bytes_accessed=(B * L_in_pad * D_q * 2 + B * L_pad * D_att * 2
                        + B * L_pad * 4 + B * L_in_pad * D_att * 4
                        + B * L_in_pad * L_pad * attn_itemsize),
    )

    vmem_limit = int(vmem_limit_bytes) if vmem_limit_bytes else 56 * 1024 * 1024

    def run(single_buffer):
        def inv_spec(shape, index_map):
            # Blocks that only change with the batch index: single-buffer them
            # to free VMEM (their DMA is re-issued only once per batch).
            if single_buffer:
                return pl.BlockSpec(shape, index_map,
                                    pipeline_mode=pl.Buffered(1))
            return pl.BlockSpec(shape, index_map)

        in_specs = [pl.BlockSpec((1, tm, D_q), lambda b, i: (b, i, 0))]
        operands = [q]
        if not preproject:
            in_specs.append(inv_spec((D_in, D_att), lambda b, i: (0, 0)))
            operands.append(w_bf)
        in_specs += [inv_spec((1, L_pad, D_att), lambda b, i: (b, 0, 0)),
                     inv_spec((1, 1, L_pad), lambda b, i: (b, 0, 0))]
        operands += [a_bf, bias_row]

        return pl.pallas_call(
            _kernel_preproj if preproject else _kernel_with_w,
            out_shape=(jax.ShapeDtypeStruct((B, L_in_pad, D_att), jnp.float32),
                       jax.ShapeDtypeStruct((B, L_in_pad, L_pad), attn_dtype)),
            grid_spec=pltpu.PrefetchScalarGridSpec(
                num_scalar_prefetch=0,
                grid=(B, n_tiles),
                in_specs=in_specs,
                out_specs=[
                    pl.BlockSpec((1, tm, D_att), lambda b, i: (b, i, 0)),
                    pl.BlockSpec((1, tm, L_pad), lambda b, i: (b, i, 0)),
                ],
            ),
            compiler_params=pltpu.CompilerParams(
                dimension_semantics=("parallel", "arbitrary"),
                vmem_limit_bytes=vmem_limit,
            ),
            cost_estimate=cost,
        )(*operands)

    try:
        ctx, attn = run(single_buffer=True)
    except Exception:
        # pl.Buffered(1) unavailable in this jax build -> default double buffering.
        ctx, attn = run(single_buffer=False)

    if L_in_pad != L_in:
        ctx = ctx[:, :L_in, :]
        attn = attn[:, :L_in, :]
    if L_pad != L_att:
        attn = attn[:, :, :L_att]
    # attn.unsqueeze(-2): (B, L_in, 1, L_att)
    return ctx, attn[:, :, None, :]


def _reference(inputs, attend_over, attend_mask, weight, bias):
    """Pure-JAX f32 reference of the PyTorch forward semantics."""
    logits = jnp.einsum("bid,de,bje->bij", inputs, weight, attend_over) + bias
    mask = attend_mask[:, None, :] > 0
    masked = jnp.where(mask, logits, -1e32)
    attn = jax.nn.softmax(masked, axis=-1)
    ctx = jnp.einsum("bij,bjd->bid", attn, attend_over)
    return ctx, attn[:, :, None, :]


if __name__ == "__main__":
    key = jax.random.PRNGKey(0)
    k1, k2, k3 = jax.random.split(key, 3)

    B, L_in, L_att = 2, 8, 16
    D_in, D_att = 32, 32

    inputs = jax.random.normal(k1, (B, L_in, D_in), dtype=jnp.float32)
    attend_over = jax.random.normal(k2, (B, L_att, D_att), dtype=jnp.float32)

    # Deterministic mask: first batch keeps 12 tokens, second keeps 10.
    lengths = jnp.array([12, 10], dtype=jnp.int32)
    attend_mask = (jnp.arange(L_att)[None, :] < lengths[:, None]).astype(jnp.int32)

    # Deterministic bilinear-attention parameters.
    weight = (jax.random.normal(k3, (D_in, D_att), dtype=jnp.float32)
              / jnp.sqrt(jnp.float32(D_in)))
    bias = jnp.float32(0.1)

    ctx, attn = allennlp_matrix_attention_wrapper(
        inputs, attend_over, attend_mask, weight, bias)
    jax.block_until_ready((ctx, attn))

    ctx_ref, attn_ref = _reference(inputs, attend_over, attend_mask, weight, bias)
    assert ctx.shape == (B, L_in, D_att)
    assert attn.shape == (B, L_in, 1, L_att)

    # bf16 MXU operands -> relaxed tolerances vs the pure-f32 reference.
    assert jnp.allclose(attn, attn_ref, atol=3e-2, rtol=3e-2)
    assert jnp.allclose(ctx, ctx_ref, atol=5e-2, rtol=5e-2)

    # Tight structural checks: rows sum to ~1 (exact divide), masked positions ~0.
    assert jnp.allclose(attn.sum(axis=-1), 1.0, atol=2e-3)
    masked_attn = jnp.where(attend_mask[:, None, None, :] == 0, attn, 0.0)
    assert float(jnp.max(jnp.abs(masked_attn))) < 1e-6

    print("KERNEL_OK")
</pallas_src>

<mosaic_0001>
module attributes {stable_mosaic.version = 11 : i64} {
  func.func @_kernel_preproj(%arg0: i32, %arg1: i32, %arg2: memref<1x8x32xbf16, #tpu.memory_space<vmem>>, %arg3: memref<1x128x32xbf16, #tpu.memory_space<vmem>>, %arg4: memref<1x1x128xf32, #tpu.memory_space<vmem>>, %arg5: memref<1x8x32xf32, #tpu.memory_space<vmem>>, %arg6: memref<1x8x128xf32, #tpu.memory_space<vmem>>) attributes {dimension_semantics = [#tpu.dimension_semantics<parallel>, #tpu.dimension_semantics<arbitrary>], iteration_bounds = array<i64: 2, 1>, scalar_prefetch = 0 : i64, scratch_operands = 0 : i64, tpu.core_type = #tpu.core_type<tc>, window_params = [{transform_indices = @transform_0, window_bounds = array<i64: 1, 8, 32>}, {pipeline_mode = #tpu.pipeline_mode<synchronous>, transform_indices = @transform_1, window_bounds = array<i64: 1, 128, 32>}, {pipeline_mode = #tpu.pipeline_mode<synchronous>, transform_indices = @transform_2, window_bounds = array<i64: 1, 1, 128>}, {transform_indices = @transform_3, window_bounds = array<i64: 1, 8, 32>}, {transform_indices = @transform_4, window_bounds = array<i64: 1, 8, 128>}]} {
    %c0 = arith.constant 0 : index
    %c0_0 = arith.constant 0 : index
    %c0_1 = arith.constant 0 : index
    %0 = vector.load %arg2[%c0, %c0_0, %c0_1] : memref<1x8x32xbf16, #tpu.memory_space<vmem>>, vector<1x8x32xbf16>
    %1 = vector.shape_cast %0 : vector<1x8x32xbf16> to vector<8x32xbf16>
    %c0_2 = arith.constant 0 : index
    %c0_3 = arith.constant 0 : index
    %c0_4 = arith.constant 0 : index
    %2 = vector.load %arg3[%c0_2, %c0_3, %c0_4] : memref<1x128x32xbf16, #tpu.memory_space<vmem>>, vector<1x128x32xbf16>
    %3 = vector.shape_cast %2 : vector<1x128x32xbf16> to vector<128x32xbf16>
    %c0_5 = arith.constant 0 : index
    %c0_6 = arith.constant 0 : index
    %c0_7 = arith.constant 0 : index
    %4 = vector.load %arg4[%c0_5, %c0_6, %c0_7] : memref<1x1x128xf32, #tpu.memory_space<vmem>>, vector<1x1x128xf32>
    %5 = vector.shape_cast %4 : vector<1x1x128xf32> to vector<1x128xf32>
    %cst = arith.constant dense<0.000000e+00> : vector<8x128xf32>
    %6 = tpu.matmul %1, %3, %cst {dimension_numbers = #tpu.dot_dimension_numbers<[1], [1], [0], [0], [0, 0, 1, 0], [], []>} : vector<8x32xbf16>, vector<128x32xbf16>, vector<8x128xf32> -> vector<8x128xf32>
    %7 = vector.broadcast %5 : vector<1x128xf32> to vector<8x128xf32>
    %8 = arith.addf %6, %7 : vector<8x128xf32>
    %cst_8 = arith.constant dense<0xFF800000> : vector<8xf32>
    %9 = vector.multi_reduction <maximumf>, %8, %cst_8 [1] : vector<8x128xf32> to vector<8xf32>
    %10 = vector.shape_cast %9 : vector<8xf32> to vector<8x1xf32>
    %11 = vector.broadcast %10 : vector<8x1xf32> to vector<8x128xf32>
    %12 = arith.subf %8, %11 : vector<8x128xf32>
    %13 = math.exp %12 : vector<8x128xf32>
    %cst_9 = arith.constant dense<0.000000e+00> : vector<8xf32>
    %14 = vector.multi_reduction <add>, %13, %cst_9 [1] : vector<8x128xf32> to vector<8xf32>
    %15 = vector.shape_cast %14 : vector<8xf32> to vector<8x1xf32>
    %cst_10 = arith.constant 1.000000e+00 : f32
    %16 = vector.broadcast %cst_10 : f32 to vector<8x1xf32>
    %17 = arith.divf %16, %15 : vector<8x1xf32>
    %18 = vector.broadcast %17 : vector<8x1xf32> to vector<8x128xf32>
    %19 = arith.mulf %13, %18 : vector<8x128xf32>
    %20 = arith.truncf %19 : vector<8x128xf32> to vector<8x128xbf16>
    %cst_11 = arith.constant dense<0.000000e+00> : vector<8x32xf32>
    %21 = tpu.matmul %20, %3, %cst_11 {dimension_numbers = #tpu.dot_dimension_numbers<[1], [0], [0], [1], [0, 0, 1, 1], [], []>} : vector<8x128xbf16>, vector<128x32xbf16>, vector<8x32xf32> -> vector<8x32xf32>
    %c0_12 = arith.constant 0 : index
    %c0_13 = arith.constant 0 : index
    %c0_14 = arith.constant 0 : index
    %22 = vector.load %arg5[%c0_12, %c0_13, %c0_14] : memref<1x8x32xf32, #tpu.memory_space<vmem>>, vector<1x8x32xf32>
    %23 = vector.shape_cast %22 : vector<1x8x32xf32> to vector<8x32xf32>
    %24 = vector.shape_cast %21 : vector<8x32xf32> to vector<1x8x32xf32>
    tpu.vector_store %arg5[%c0_12, %c0_13, %c0_14], %24 {strides = array<i32>} : memref<1x8x32xf32, #tpu.memory_space<vmem>>, vector<1x8x32xf32>,
    %c0_15 = arith.constant 0 : index
    %c0_16 = arith.constant 0 : index
    %c0_17 = arith.constant 0 : index
    %25 = vector.load %arg6[%c0_15, %c0_16, %c0_17] : memref<1x8x128xf32, #tpu.memory_space<vmem>>, vector<1x8x128xf32>
    %26 = vector.shape_cast %25 : vector<1x8x128xf32> to vector<8x128xf32>
    %27 = vector.shape_cast %19 : vector<8x128xf32> to vector<1x8x128xf32>
    tpu.vector_store %arg6[%c0_15, %c0_16, %c0_17], %27 {strides = array<i32>} : memref<1x8x128xf32, #tpu.memory_space<vmem>>, vector<1x8x128xf32>,
    return
  }
  func.func @transform_0(%arg0: i32, %arg1: i32) -> (i32, i32, i32) {
    %c0_i32 = arith.constant 0 : i32
    %c0_i32_0 = arith.constant 0 : i32
    return %arg0, %arg1, %c0_i32 : i32, i32, i32
  }
  func.func @transform_1(%arg0: i32, %arg1: i32) -> (i32, i32, i32) {
    %c0_i32 = arith.constant 0 : i32
    %c0_i32_0 = arith.constant 0 : i32
    %c0_i32_1 = arith.constant 0 : i32
    return %arg0, %c0_i32, %c0_i32_0 : i32, i32, i32
  }
  func.func @transform_2(%arg0: i32, %arg1: i32) -> (i32, i32, i32) {
    %c0_i32 = arith.constant 0 : i32
    %c0_i32_0 = arith.constant 0 : i32
    %c0_i32_1 = arith.constant 0 : i32
    return %arg0, %c0_i32, %c0_i32_0 : i32, i32, i32
  }
  func.func @transform_3(%arg0: i32, %arg1: i32) -> (i32, i32, i32) {
    %c0_i32 = arith.constant 0 : i32
    %c0_i32_0 = arith.constant 0 : i32
    return %arg0, %arg1, %c0_i32 : i32, i32, i32
  }
  func.func @transform_4(%arg0: i32, %arg1: i32) -> (i32, i32, i32) {
    %c0_i32 = arith.constant 0 : i32
    %c0_i32_0 = arith.constant 0 : i32
    return %arg0, %arg1, %c0_i32 : i32, i32, i32
  }
}

module attributes {stable_mosaic.version = 11 : i64} {
  func.func @_kernel_preproj(%arg0: i32, %arg1: i32, %arg2: memref<1x8x32xbf16, #tpu.memory_space<vmem>>, %arg3: memref<1x128x32xbf16, #tpu.memory_space<vmem>>, %arg4: memref<1x1x128xf32, #tpu.memory_space<vmem>>, %arg5: memref<1x8x32xf32, #tpu.memory_space<vmem>>, %arg6: memref<1x8x128xf32, #tpu.memory_space<vmem>>) attributes {dimension_semantics = [#tpu.dimension_semantics<parallel>, #tpu.dimension_semantics<arbitrary>], iteration_bounds = array<i64: 2, 1>, scalar_prefetch = 0 : i64, scratch_operands = 0 : i64, tpu.core_type = #tpu.core_type<tc>, window_params = [{transform_indices = @transform_0, window_bounds = array<i64: 1, 8, 32>}, {transform_indices = @transform_1, window_bounds = array<i64: 1, 128, 32>}, {transform_indices = @transform_2, window_bounds = array<i64: 1, 1, 128>}, {transform_indices = @transform_3, window_bounds = array<i64: 1, 8, 32>}, {transform_indices = @transform_4, window_bounds = array<i64: 1, 8, 128>}]} {
    %c0 = arith.constant 0 : index
    %c0_0 = arith.constant 0 : index
    %c0_1 = arith.constant 0 : index
    %0 = vector.load %arg2[%c0, %c0_0, %c0_1] : memref<1x8x32xbf16, #tpu.memory_space<vmem>>, vector<1x8x32xbf16>
    %1 = vector.shape_cast %0 : vector<1x8x32xbf16> to vector<8x32xbf16>
    %c0_2 = arith.constant 0 : index
    %c0_3 = arith.constant 0 : index
    %c0_4 = arith.constant 0 : index
    %2 = vector.load %arg3[%c0_2, %c0_3, %c0_4] : memref<1x128x32xbf16, #tpu.memory_space<vmem>>, vector<1x128x32xbf16>
    %3 = vector.shape_cast %2 : vector<1x128x32xbf16> to vector<128x32xbf16>
    %c0_5 = arith.constant 0 : index
    %c0_6 = arith.constant 0 : index
    %c0_7 = arith.constant 0 : index
    %4 = vector.load %arg4[%c0_5, %c0_6, %c0_7] : memref<1x1x128xf32, #tpu.memory_space<vmem>>, vector<1x1x128xf32>
    %5 = vector.shape_cast %4 : vector<1x1x128xf32> to vector<1x128xf32>
    %cst = arith.constant dense<0.000000e+00> : vector<8x128xf32>
    %6 = tpu.matmul %1, %3, %cst {dimension_numbers = #tpu.dot_dimension_numbers<[1], [1], [0], [0], [0, 0, 1, 0], [], []>} : vector<8x32xbf16>, vector<128x32xbf16>, vector<8x128xf32> -> vector<8x128xf32>
    %7 = vector.broadcast %5 : vector<1x128xf32> to vector<8x128xf32>
    %8 = arith.addf %6, %7 : vector<8x128xf32>
    %cst_8 = arith.constant dense<0xFF800000> : vector<8xf32>
    %9 = vector.multi_reduction <maximumf>, %8, %cst_8 [1] : vector<8x128xf32> to vector<8xf32>
    %10 = vector.shape_cast %9 : vector<8xf32> to vector<8x1xf32>
    %11 = vector.broadcast %10 : vector<8x1xf32> to vector<8x128xf32>
    %12 = arith.subf %8, %11 : vector<8x128xf32>
    %13 = math.exp %12 : vector<8x128xf32>
    %cst_9 = arith.constant dense<0.000000e+00> : vector<8xf32>
    %14 = vector.multi_reduction <add>, %13, %cst_9 [1] : vector<8x128xf32> to vector<8xf32>
    %15 = vector.shape_cast %14 : vector<8xf32> to vector<8x1xf32>
    %cst_10 = arith.constant 1.000000e+00 : f32
    %16 = vector.broadcast %cst_10 : f32 to vector<8x1xf32>
    %17 = arith.divf %16, %15 : vector<8x1xf32>
    %18 = vector.broadcast %17 : vector<8x1xf32> to vector<8x128xf32>
    %19 = arith.mulf %13, %18 : vector<8x128xf32>
    %20 = arith.truncf %19 : vector<8x128xf32> to vector<8x128xbf16>
    %cst_11 = arith.constant dense<0.000000e+00> : vector<8x32xf32>
    %21 = tpu.matmul %20, %3, %cst_11 {dimension_numbers = #tpu.dot_dimension_numbers<[1], [0], [0], [1], [0, 0, 1, 1], [], []>} : vector<8x128xbf16>, vector<128x32xbf16>, vector<8x32xf32> -> vector<8x32xf32>
    %c0_12 = arith.constant 0 : index
    %c0_13 = arith.constant 0 : index
    %c0_14 = arith.constant 0 : index
    %22 = vector.load %arg5[%c0_12, %c0_13, %c0_14] : memref<1x8x32xf32, #tpu.memory_space<vmem>>, vector<1x8x32xf32>
    %23 = vector.shape_cast %22 : vector<1x8x32xf32> to vector<8x32xf32>
    %24 = vector.shape_cast %21 : vector<8x32xf32> to vector<1x8x32xf32>
    tpu.vector_store %arg5[%c0_12, %c0_13, %c0_14], %24 {strides = array<i32>} : memref<1x8x32xf32, #tpu.memory_space<vmem>>, vector<1x8x32xf32>,
    %c0_15 = arith.constant 0 : index
    %c0_16 = arith.constant 0 : index
    %c0_17 = arith.constant 0 : index
    %25 = vector.load %arg6[%c0_15, %c0_16, %c0_17] : memref<1x8x128xf32, #tpu.memory_space<vmem>>, vector<1x8x128xf32>
    %26 = vector.shape_cast %25 : vector<1x8x128xf32> to vector<8x128xf32>
    %27 = vector.shape_cast %19 : vector<8x128xf32> to vector<1x8x128xf32>
    tpu.vector_store %arg6[%c0_15, %c0_16, %c0_17], %27 {strides = array<i32>} : memref<1x8x128xf32, #tpu.memory_space<vmem>>, vector<1x8x128xf32>,
    return
  }
  func.func @transform_0(%arg0: i32, %arg1: i32) -> (i32, i32, i32) {
    %c0_i32 = arith.constant 0 : i32
    %c0_i32_0 = arith.constant 0 : i32
    return %arg0, %arg1, %c0_i32 : i32, i32, i32
  }
  func.func @transform_1(%arg0: i32, %arg1: i32) -> (i32, i32, i32) {
    %c0_i32 = arith.constant 0 : i32
    %c0_i32_0 = arith.constant 0 : i32
    %c0_i32_1 = arith.constant 0 : i32
    return %arg0, %c0_i32, %c0_i32_0 : i32, i32, i32
  }
  func.func @transform_2(%arg0: i32, %arg1: i32) -> (i32, i32, i32) {
    %c0_i32 = arith.constant 0 : i32
    %c0_i32_0 = arith.constant 0 : i32
    %c0_i32_1 = arith.constant 0 : i32
    return %arg0, %c0_i32, %c0_i32_0 : i32, i32, i32
  }
  func.func @transform_3(%arg0: i32, %arg1: i32) -> (i32, i32, i32) {
    %c0_i32 = arith.constant 0 : i32
    %c0_i32_0 = arith.constant 0 : i32
    return %arg0, %arg1, %c0_i32 : i32, i32, i32
  }
  func.func @transform_4(%arg0: i32, %arg1: i32) -> (i32, i32, i32) {
    %c0_i32 = arith.constant 0 : i32
    %c0_i32_0 = arith.constant 0 : i32
    return %arg0, %arg1, %c0_i32 : i32, i32, i32
  }
}

</mosaic_0001>

<bundles_post_ra>
// kernel: tpu_custom_call.1
= control target key start
LH: loop header
LB: loop body
LE: loop exit
PB: predicated region body
PF: predicated region fallthrough
CT: control target
= control target key end

     0   :  { %10 = vsyncpa [#allocation3], 0  ;;  %s1102_s0 = inlined_call_operand.vmem [shape: bf16[2,8,32], index: 0, kind: input, shape index: {}]   ;;  %s1103_s1 = inlined_call_operand.vmem [shape: bf16[2,128,32], index: 1, kind: input, shape index: {}]   ;;  %s1104_s2 = inlined_call_operand.vmem [shape: f32[2,1,128], index: 2, kind: input, shape index: {}]   ;;  %s1105_s3 = inlined_call_operand.hbm [shape: f32[2,8,32], index: 3, kind: output, shape index: {0}]   ;;  %s1106_s4 = inlined_call_operand.hbm [shape: f32[2,8,128], index: 4, kind: output, shape index: {1}]  }
   0x1   :  { %12 = vsyncpa [#allocation3 + $0x1], 0 }
   0x2   :  { %13 = vsyncpa [#allocation5], 0 }
   0x3   :  { %15 = vsyncpa [#allocation5 + $0x1], 0  ;;  %s924_s15 = smov 0   ;;  %s926_s16 = smov 0  }
   0x4   :  { %s928_s17 = smov 0   ;;  %s930_s18 = smov 0  }
   0x5   :  { %s932_s19 = smov 0   ;;  %s934_s20 = smov 0  }
   0x6 LB: > { %s624_s21 = sadd.s32 4294967295, %s893_s20   ;;  %s625_s22 = sadd.s32 4294967294, %s893_s20   ;;  %s893_s20 = sphi %s934_s20, %s21_s20   ;;  %s889_s19 = sphi %s932_s19, %s1113_s19   ;;  %s885_s18 = sphi %s930_s18, %s1112_s18   ;;  %s881_s17 = sphi %s928_s17, %s1111_s17   ;;  %s877_s16 = sphi %s926_s16, %s1110_s16   ;;  %s873_s15 = sphi %s924_s15, %s1109_s15  }
   0x7   : > { %s33_s23 = sadd.s32 1, %s889_s19  ;;  %s122_s24 = sadd.s32 1, %s881_s17 }
   0x8   : > { %p35_p0 = scmp.ge.s32.totalorder %s33_s23, 2  ;;  %p132_p1 = scmp.ne.s32.totalorder %s881_s17, %s877_s16 }
   0x9   : > { %p133_p2 = scmp.eq.s32.totalorder %s624_s21, 1  ;;  %p138_p3 = scmp.ne.s32.totalorder %s877_s16, %s873_s15 }
   0xa   : > { %s1115_s23 = smov (%p35_p0, %s33_s23), 0  ;;  %p139_p5 = scmp.eq.s32.totalorder %s625_s22, 1 }
   0xb   : > { %p964_p4 = por %p133_p2, %p132_p1  ;;  %s117_s26 = ssub.s32 %s889_s19, %s1115_s23 }
   0xc   : > { %p628_p6 = scmp.ge.s32.totalorder %s893_s20, 1  ;;  %p120_p7 = scmp.eq.s32.totalorder %s117_s26, 0 }
   0xd   : > { %p971_p8 = por %p139_p5, %p138_p3  ;;  %p209_p9 = scmp.lt.s32.totalorder %s893_s20, 3 }
   0xe   : > { %s977_s28 = scalar_select %p120_p7, %s881_s17, %s122_s24  }
   0xf   : > { %p210_p10 = pnand %p628_p6, %p209_p9 }
  0x10   : > { %p250_p11 = scmp.lt.s32.totalorder (!%p210_p10), %s885_s18, 1  ;;  %v895_v0 = vmov (!%p210_p10), 0.0   ;;  %vm896_vm0 = vmmov (!%p210_p10), 0   ;;  %vm330_vm1 = vcmask (!%p210_p10), 261120   ;;  %s1015_s21 = sand.u32 (!%p210_p10), 1, %s877_s16  }
  0x11   : > { %213 = sbr.rel (%p210_p10) target bundleno = 848 (0x350), region = 32  ;;  %669 = vmatprep.subr.bf16.mxu0 (!%p210_p10), %v895_v0  ;;  %685 = vmatprep.mubr.msk.bf16.mxu0 (!%p210_p10), %vm896_vm0, %v895_v0  ;;  %s629_s22 = sshll.u32 (!%p210_p10), %s1015_s21, 3 }
  0x12   : > { %689 = vmatprep.subr.bf16.mxu1 (!%p210_p10), %v895_v0  ;;  %705 = vmatprep.mubr.msk.bf16.mxu1 (!%p210_p10), %vm896_vm0, %v895_v0  ;;  %s249_s24 = scalar_lea.vmem (!%p210_p10), [#allocation4], %s629_s22  ;;  %s646_s26 = sshll.u32 (!%p210_p10), %s885_s18, 7 }
  0x13   : > { %s1026_s5 = scalar_lea.hbm (!%p210_p10), %s1106_s4, %s646_s26  ;;  %s493_s6 = sshll.u32 (!%p210_p10), %s249_s24, 4  ;;  %s494_s6 = int_to_ptr.vmem [resolvable:$true] %s493_s6 }
  0x14   : > { %s897_s9 = smov (!%p210_p10), [#allocation4]  }
  0x15   : > { %s787_s10 = sshll.u32 (!%p210_p10), %s897_s9, 4  ;;  %s788_s10 = int_to_ptr.vmem [resolvable:$false] %s787_s10 }
  0x16   : > { %p790_p1 = scmp.lt.s32.totalorder (!%p210_p10), %s494_s6, %s788_s10 }
  0x18   : > { %s981_s29 = scalar_select %p250_p11, %s885_s18, 1 }
  0x1a   : > { %s650_s30 = sshll.u32 %s981_s29, 6  ;;  %s631_s8 = sshll.u32 %s981_s29, 2 }
  0x1b   : > { %s987_s7 = scalar_lea.vmem %s1103_s1, %s650_s30  ;;  %s256_s11 = scalar_lea.vmem %s1102_s0, %s631_s8 }
  0x1c   : > { %v771_v1 = vld [vmem:[%s987_s7] sm:$0xff]   ;;  %v772_v3 = vld [vmem:[%s987_s7 + $0x8] sm:$0xff]   ;;  %v773_v5 = vld [vmem:[%s987_s7 + $0x10] sm:$0xff]   ;;  %s264_s14 = scalar_lea.vmem %s1104_s2, %s981_s29  ;;  %s783_s8 = scalar_lea.vmem %s494_s6, 128 }
  0x1d   : > { %v335_v2 = vsel %vm330_vm1, %v771_v1, 0  ;;  %690 = vmatpush3.bf16.msra.mxu1 %v771_v1  ;;  %v338_v4 = vsel %vm330_vm1, %v772_v3, 0  ;;  %v774_v6 = vld [vmem:[%s987_s7 + $0x18] sm:$0xff]   ;;  %v341_v7 = vsel %vm330_vm1, %v773_v5, 0  ;;  %v775_v8 = vld [vmem:[%s987_s7 + $0x20] sm:$0xff]   ;;  %v776_v9 = vld [vmem:[%s987_s7 + $0x28] sm:$0xff]   ;;  %p784_p12 = scmp.ne.s32.totalorder %s494_s6, %s783_s8 }
  0x1e   : > { %670 = vmatpush3.bf16.xpose.msra.mxu0 %v335_v2  ;;  %691 = vmatprep.subr.bf16.mxu1 %v895_v0  ;;  %v344_v10 = vsel %vm330_vm1, %v774_v6, 0  ;;  %v777_v11 = vld [vmem:[%s987_s7 + $0x30] sm:$0xff]   ;;  %v778_v12 = vld [vmem:[%s987_s7 + $0x38] sm:$0xff]   ;;  %v347_v13 = vsel %vm330_vm1, %v775_v8, 0  ;;  %v350_v14 = vsel %vm330_vm1, %v776_v9, 0  ;;  %s465_s7 = scalar_lea.sflag [#allocation5], %s1015_s21 }
  0x1f   : > { %671 = vmatprep.subr.bf16.mxu0 %v895_v0  ;;  %v353_v15 = vsel %vm330_vm1, %v777_v11, 0  ;;  %v356_v16 = vsel %vm330_vm1, %v778_v12, 0  ;;  %v266_v17 = vld [vmem:[%s256_s11] sm:$0xf]  ;;  %p785_p13 = pnand %p784_p12, %p964_p4  ;;  %s789_s11 = scalar_lea.vmem %s788_s10, 256 }
  0x20   : > { %v634_v18 = vld [vmem:[%s264_s14] ss:$0 sm:$0xff]  ;;  %p791_p2 = scmp.lt.s32.totalorder %s789_s11, %s783_s8 }
  0x21   : > { %692 = vmatpush3.bf16.msra.mxu1 %v772_v3  ;;  %p786_p0 = pneg %p785_p13 }
  0x22   : > { %693 = vmatprep.subr.bf16.mxu1 %v895_v0  ;;  %p792_p3 = por %p791_p2, %p790_p1 }
  0x24   : > { %p793_p5 = pnand %p792_p3, %p786_p0 }
  0x25   : > { %694 = vmatpush3.bf16.msra.mxu1 %v773_v5 }
  0x26   : > { %672 = vmatpush3.bf16.xpose.msra.mxu0 %v338_v4  ;;  %695 = vmatprep.subr.bf16.mxu1 %v895_v0 }
  0x27   : > { %673 = vmatprep.subr.bf16.mxu0 %v895_v0 }
  0x29   : > { %696 = vmatpush3.bf16.msra.mxu1 %v774_v6 }
  0x2a   : > { %697 = vmatprep.subr.bf16.mxu1 %v895_v0 }
  0x2d   : > { %698 = vmatpush3.bf16.msra.mxu1 %v775_v8 }
  0x2e   : > { %674 = vmatpush3.bf16.xpose.msra.mxu0 %v341_v7  ;;  %699 = vmatprep.subr.bf16.mxu1 %v895_v0 }
  0x2f   : > { %675 = vmatprep.subr.bf16.mxu0 %v895_v0 }
  0x31   : > { %700 = vmatpush3.bf16.msra.mxu1 %v776_v9 }
  0x32   : > { %701 = vmatprep.subr.bf16.mxu1 %v895_v0 }
  0x35   : > { %702 = vmatpush3.bf16.msra.mxu1 %v777_v11 }
  0x36   : > { %676 = vmatpush3.bf16.xpose.msra.mxu0 %v344_v10  ;;  %703 = vmatprep.subr.bf16.mxu1 %v895_v0 }
  0x37   : > { %677 = vmatprep.subr.bf16.mxu0 %v895_v0 }
  0x39   : > { %704 = vmatpush3.bf16.msra.mxu1 %v778_v12 }
  0x3e   : > { %678 = vmatpush3.bf16.xpose.msra.mxu0 %v347_v13 }
  0x3f   : > { %679 = vmatprep.subr.bf16.mxu0 %v895_v0 }
  0x46   : > { %680 = vmatpush3.bf16.xpose.msra.mxu0 %v350_v14 }
  0x47   : > { %681 = vmatprep.subr.bf16.mxu0 %v895_v0 }
  0x4e   : > { %682 = vmatpush3.bf16.xpose.msra.mxu0 %v353_v15 }
  0x4f   : > { %683 = vmatprep.subr.bf16.mxu0 %v895_v0 }
  0x56   : > { %684 = vmatpush3.bf16.xpose.msra.mxu0 %v356_v16 }
  0x5d   : > { %686 = vmatmul.mubr.msk.bf16.vlgmr.msra.gmra.mrb[0].mxu0 %vm330_vm1, %v266_v17 }
 0x130   : > { %v392_v19 = vpop.f32.mrb[0].mxu0 }
 0x131   : > { %v393_v20 = vadd.f32 %v634_v18, %v392_v19  ;;  %v687_v21 = vpop.f32.mrb[1].mxu0 }
 0x132   : > { %v395_v22 = vpop.f32.mrb[2].mxu0 }
 0x133   : > { %398 = vmax.xlane.f32.xlu0 %v393_v20  ;;  %v688_v23 = vpop.f32.mrb[3].mxu0 }
 0x1c0   : > { %v399_v24 = vpop.xlane.xlu0 %398 }
 0x1c1   : > { %v400_v25 = vsub.f32 %v393_v20, %v399_v24 }
 0x1c3   : > { %v401_v26 = vmul.f32 1.442695, %v400_v25 }
 0x1c5   : > { %779 = vpow2.f32 %v401_v26 }
 0x1cf   : > { %v780_v27 = vpop.eup %779 }
 0x1d0   : > { %403 = vadd.xlane.f32.xlu0 %v780_v27 }
 0x25d   : > { %v404_v28 = vpop.xlane.xlu0 %403 }
 0x25e   : > { %781 = vrcp.f32 %v404_v28 }
 0x268   : > { %v782_v29 = vpop.eup %781 }
 0x269   : > { %v407_v30 = vmul.f32 %v782_v29, %v780_v27 }
 0x26b   : > { %v408_v31 = vpack.c.bf16 %v407_v30, %v407_v30  ;;  %458 = vst [vmem:[%s249_s24] sm:$0xff] %v407_v30 }
 0x26d   : > { %706 = vmatmul.mubr.bf16.vlgmr.msra.gmra.mrb[0].mxu1 %v408_v31 }
 0x26e   : > { %796 = shalt.err (!%p793_p5)
}
 0x26f   : > { %s797_s12 = scalar_lea.hbm %s1026_s5, 128  ;;  %s801_s24 = scalar_lea.hbm %s1106_s4, 256 }
 0x270   : > { %p798_p6 = scmp.ne.s32.totalorder %s1026_s5, %s797_s12  ;;  %p802_p10 = scmp.lt.u32.totalorder %s1026_s5, %s1106_s4 }
 0x271   : > { %p803_p11 = scmp.lt.u32.totalorder %s801_s24, %s797_s12  ;;  %p805_p13 = scmp.lt.u32.totalorder %s797_s12, %s1026_s5 }
 0x272   : > { %p799_p7 = pnand %p798_p6, %p964_p4 }
 0x273   : > { %p804_p12 = por %p803_p11, %p802_p10 }
 0x274   : > { %p800_p9 = pneg %p799_p7 }
 0x275   : > { %p806_p0 = por %p805_p13, %p804_p12 }
 0x277   : > { %p807_p1 = pnand %p806_p0, %p800_p9 }
 0x279   : > { %810 = shalt.err (!%p807_p1)
}
 0x27a   : > { %710 = dma.vmem_to_hbm [thread:$0]  (%p964_p4), %s494_s6, 128, %s1026_s5, %s465_s7  }
 0x27b   : > { %s242_s8 = scalar_lea.vmem [#allocation2], %s629_s22  ;;  %s1053_s13 = scalar_lea.hbm %s1105_s3, %s646_s26 }
 0x27c   : > { %s479_s9 = sshll.u32 %s242_s8, 4  ;;  %s460_s5 = scalar_lea.sflag [#allocation3], %s1015_s21  ;;  %s1055_s9 = int_to_ptr.vmem [resolvable:$true] %s479_s9 }
 0x27d   : > { %s811_s6 = scalar_lea.vmem %s1055_s9, 128  ;;  %s898_s18 = smov [#allocation2]  }
 0x27e   : > { %p812_p2 = scmp.ne.s32.totalorder %s1055_s9, %s811_s6  ;;  %s815_s22 = sshll.u32 %s898_s18, 4  ;;  %s816_s22 = int_to_ptr.vmem [resolvable:$false] %s815_s22 }
 0x27f   : > { %s817_s26 = scalar_lea.vmem %s816_s22, 256  ;;  %p818_p6 = scmp.lt.s32.totalorder %s1055_s9, %s816_s22 }
 0x280   : > { %p813_p3 = pnand %p812_p2, %p964_p4  ;;  %p819_p7 = scmp.lt.s32.totalorder %s817_s26, %s811_s6 }
 0x282   : > { %p814_p5 = pneg %p813_p3  ;;  %p820_p9 = por %p819_p7, %p818_p6 }
 0x284   : > { %p821_p10 = pnand %p820_p9, %p814_p5 }
 0x340   : > { %v451_v32 = vpop.f32.mrb[0].mxu1 }
 0x341   : > { %457 = vst.msk [vmem:[%s242_s8] sm:$0xff] %vm330_vm1, %v451_v32  ;;  %v707_v33 = vpop.f32.mrb[1].mxu1 }
 0x342   : > { %v454_v34 = vpop.f32.mrb[2].mxu1 }
 0x343   : > { %824 = shalt.err (!%p821_p10)
}
 0x344   : > { %s825_s21 = scalar_lea.hbm %s1053_s13, 128  ;;  %s829_s14 = scalar_lea.hbm %s1105_s3, 256 }
 0x345   : > { %p826_p11 = scmp.ne.s32.totalorder %s1053_s13, %s825_s21  ;;  %p830_p0 = scmp.lt.u32.totalorder %s1053_s13, %s1105_s3 }
 0x346   : > { %p831_p1 = scmp.lt.u32.totalorder %s829_s14, %s825_s21  ;;  %p833_p3 = scmp.lt.u32.totalorder %s825_s21, %s1053_s13 }
 0x347   : > { %p827_p12 = pnand %p826_p11, %p964_p4 }
 0x348   : > { %p832_p2 = por %p831_p1, %p830_p0 }
 0x349   : > { %p828_p13 = pneg %p827_p12 }
 0x34a   : > { %p834_p5 = por %p833_p3, %p832_p2 }
 0x34c   : > { %p835_p6 = pnand %p834_p5, %p828_p13 }
 0x34e   : > { %838 = shalt.err (!%p835_p6)
}
 0x34f   : > { %709 = dma.vmem_to_hbm [thread:$0]  (%p964_p4), %s1055_s9, 128, %s1053_s13, %s460_s5   ;;  %v708_v35 = vpop.f32.mrb[3].mxu1 }
 0x350 PF: > { %p720_p7 = scmp.ge.s32.totalorder %s893_s20, 2  ;;  %s505_s30 = sand.u32 1, %s873_s15  }
 0x351   : > { %s506_s8 = scalar_lea.sflag [#allocation3], %s505_s30 }
 0x352   : > { %p714_p9 = pnand %p720_p7, %p971_p8 }
 0x354   : > { %864 = dma.done.wait (!%p714_p9), %s506_s8, 128  }
 0x355   : > { %866 = vsyncadd (!%p714_p9), %s506_s8, 4294967168  ;;  %s515_s10 = scalar_lea.sflag [#allocation5], %s505_s30 }
 0x356   : > { %868 = dma.done.wait (!%p714_p9), %s515_s10, 128  }
 0x357   : > { %870 = vsyncadd (!%p714_p9), %s515_s10, 4294967168  ;;  %s21_s20 = sadd.s32 1, %s893_s20   ;;  %s1109_s15 = smov %s877_s16 }
 0x358   : > { %p18_p10 = scmp.ge.s32.totalorder %s21_s20, 4   ;;  %s1110_s16 = smov %s881_s17 }
 0x359   : > { %s1111_s17 = smov %s977_s28  ;;  %s1112_s18 = smov %s889_s19 }
 0x35a   : > { %s1113_s19 = smov %s1115_s23  ;;  %20 = sbr.rel (!%p18_p10) target bundleno = 6 (0x6), region = 90 }
 0x361   :  { %520 = vsyncpa [#allocation3], 1 }
 0x362   :  { %522 = vsyncpa [#allocation3 + $0x1], 1 }
 0x363   :  { %523 = vsyncpa [#allocation5], 1 }
 0x364   :  { %525 = vsyncpa [#allocation5 + $0x1], 1 }

// kernel: tpu_custom_call.1
= control target key start
LH: loop header
LB: loop body
LE: loop exit
PB: predicated region body
PF: predicated region fallthrough
CT: control target
= control target key end

     0   :  { %10 = vsyncpa [#allocation3], 0  ;;  %s1096_s0 = inlined_call_operand.vmem [shape: bf16[2,8,32], index: 0, kind: input, shape index: {}]   ;;  %s1097_s1 = inlined_call_operand.vmem [shape: bf16[2,128,32], index: 1, kind: input, shape index: {}]   ;;  %s1098_s2 = inlined_call_operand.vmem [shape: f32[2,1,128], index: 2, kind: input, shape index: {}]   ;;  %s1099_s3 = inlined_call_operand.hbm [shape: f32[2,8,32], index: 3, kind: output, shape index: {0}]   ;;  %s1100_s4 = inlined_call_operand.hbm [shape: f32[2,8,128], index: 4, kind: output, shape index: {1}]  }
   0x1   :  { %12 = vsyncpa [#allocation3 + $0x1], 0 }
   0x2   :  { %13 = vsyncpa [#allocation5], 0 }
   0x3   :  { %15 = vsyncpa [#allocation5 + $0x1], 0  ;;  %s918_s15 = smov 0   ;;  %s920_s16 = smov 0  }
   0x4   :  { %s922_s17 = smov 0   ;;  %s924_s18 = smov 0  }
   0x5   :  { %s926_s19 = smov 0   ;;  %s928_s20 = smov 0  }
   0x6 LB: > { %s618_s21 = sadd.s32 4294967295, %s887_s20   ;;  %s619_s22 = sadd.s32 4294967294, %s887_s20   ;;  %s887_s20 = sphi %s928_s20, %s21_s20   ;;  %s883_s19 = sphi %s926_s19, %s1107_s19   ;;  %s879_s18 = sphi %s924_s18, %s1106_s18   ;;  %s875_s17 = sphi %s922_s17, %s1105_s17   ;;  %s871_s16 = sphi %s920_s16, %s1104_s16   ;;  %s867_s15 = sphi %s918_s15, %s1103_s15  }
   0x7   : > { %s33_s23 = sadd.s32 1, %s883_s19  ;;  %s122_s24 = sadd.s32 1, %s875_s17 }
   0x8   : > { %p35_p0 = scmp.ge.s32.totalorder %s33_s23, 2  ;;  %p132_p1 = scmp.ne.s32.totalorder %s875_s17, %s871_s16 }
   0x9   : > { %p133_p2 = scmp.eq.s32.totalorder %s618_s21, 1  ;;  %p138_p3 = scmp.ne.s32.totalorder %s871_s16, %s867_s15 }
   0xa   : > { %s1109_s23 = smov (%p35_p0, %s33_s23), 0  ;;  %p139_p5 = scmp.eq.s32.totalorder %s619_s22, 1 }
   0xb   : > { %p958_p4 = por %p133_p2, %p132_p1  ;;  %s117_s26 = ssub.s32 %s883_s19, %s1109_s23 }
   0xc   : > { %p622_p6 = scmp.ge.s32.totalorder %s887_s20, 1  ;;  %p120_p7 = scmp.eq.s32.totalorder %s117_s26, 0 }
   0xd   : > { %p965_p8 = por %p139_p5, %p138_p3  ;;  %p209_p9 = scmp.lt.s32.totalorder %s887_s20, 3 }
   0xe   : > { %s971_s28 = scalar_select %p120_p7, %s875_s17, %s122_s24  }
   0xf   : > { %p210_p10 = pnand %p622_p6, %p209_p9 }
  0x10   : > { %p250_p11 = scmp.lt.s32.totalorder (!%p210_p10), %s879_s18, 1  ;;  %v889_v0 = vmov (!%p210_p10), 0.0   ;;  %vm890_vm0 = vmmov (!%p210_p10), 0   ;;  %vm330_vm1 = vcmask (!%p210_p10), 261120   ;;  %s1009_s21 = sand.u32 (!%p210_p10), 1, %s871_s16  }
  0x11   : > { %213 = sbr.rel (%p210_p10) target bundleno = 848 (0x350), region = 32  ;;  %663 = vmatprep.subr.bf16.mxu0 (!%p210_p10), %v889_v0  ;;  %679 = vmatprep.mubr.msk.bf16.mxu0 (!%p210_p10), %vm890_vm0, %v889_v0  ;;  %s623_s22 = sshll.u32 (!%p210_p10), %s1009_s21, 3 }
  0x12   : > { %683 = vmatprep.subr.bf16.mxu1 (!%p210_p10), %v889_v0  ;;  %699 = vmatprep.mubr.msk.bf16.mxu1 (!%p210_p10), %vm890_vm0, %v889_v0  ;;  %s249_s24 = scalar_lea.vmem (!%p210_p10), [#allocation4], %s623_s22  ;;  %s640_s26 = sshll.u32 (!%p210_p10), %s879_s18, 7 }
  0x13   : > { %s1020_s5 = scalar_lea.hbm (!%p210_p10), %s1100_s4, %s640_s26  ;;  %s493_s6 = sshll.u32 (!%p210_p10), %s249_s24, 4  ;;  %s494_s6 = int_to_ptr.vmem [resolvable:$true] %s493_s6 }
  0x14   : > { %s891_s9 = smov (!%p210_p10), [#allocation4]  }
  0x15   : > { %s781_s10 = sshll.u32 (!%p210_p10), %s891_s9, 4  ;;  %s782_s10 = int_to_ptr.vmem [resolvable:$false] %s781_s10 }
  0x16   : > { %p784_p1 = scmp.lt.s32.totalorder (!%p210_p10), %s494_s6, %s782_s10 }
  0x18   : > { %s975_s29 = scalar_select %p250_p11, %s879_s18, 1 }
  0x1a   : > { %s644_s30 = sshll.u32 %s975_s29, 6  ;;  %s625_s8 = sshll.u32 %s975_s29, 2 }
  0x1b   : > { %s981_s7 = scalar_lea.vmem %s1097_s1, %s644_s30  ;;  %s256_s11 = scalar_lea.vmem %s1096_s0, %s625_s8 }
  0x1c   : > { %v765_v1 = vld [vmem:[%s981_s7] sm:$0xff]   ;;  %v766_v3 = vld [vmem:[%s981_s7 + $0x8] sm:$0xff]   ;;  %v767_v5 = vld [vmem:[%s981_s7 + $0x10] sm:$0xff]   ;;  %s264_s14 = scalar_lea.vmem %s1098_s2, %s975_s29  ;;  %s777_s8 = scalar_lea.vmem %s494_s6, 128 }
  0x1d   : > { %v335_v2 = vsel %vm330_vm1, %v765_v1, 0  ;;  %684 = vmatpush3.bf16.msra.mxu1 %v765_v1  ;;  %v338_v4 = vsel %vm330_vm1, %v766_v3, 0  ;;  %v768_v6 = vld [vmem:[%s981_s7 + $0x18] sm:$0xff]   ;;  %v341_v7 = vsel %vm330_vm1, %v767_v5, 0  ;;  %v769_v8 = vld [vmem:[%s981_s7 + $0x20] sm:$0xff]   ;;  %v770_v9 = vld [vmem:[%s981_s7 + $0x28] sm:$0xff]   ;;  %p778_p12 = scmp.ne.s32.totalorder %s494_s6, %s777_s8 }
  0x1e   : > { %664 = vmatpush3.bf16.xpose.msra.mxu0 %v335_v2  ;;  %685 = vmatprep.subr.bf16.mxu1 %v889_v0  ;;  %v344_v10 = vsel %vm330_vm1, %v768_v6, 0  ;;  %v771_v11 = vld [vmem:[%s981_s7 + $0x30] sm:$0xff]   ;;  %v772_v12 = vld [vmem:[%s981_s7 + $0x38] sm:$0xff]   ;;  %v347_v13 = vsel %vm330_vm1, %v769_v8, 0  ;;  %v350_v14 = vsel %vm330_vm1, %v770_v9, 0  ;;  %s465_s7 = scalar_lea.sflag [#allocation5], %s1009_s21 }
  0x1f   : > { %665 = vmatprep.subr.bf16.mxu0 %v889_v0  ;;  %v353_v15 = vsel %vm330_vm1, %v771_v11, 0  ;;  %v356_v16 = vsel %vm330_vm1, %v772_v12, 0  ;;  %v266_v17 = vld [vmem:[%s256_s11] sm:$0xf]  ;;  %p779_p13 = pnand %p778_p12, %p958_p4  ;;  %s783_s11 = scalar_lea.vmem %s782_s10, 256 }
  0x20   : > { %v628_v18 = vld [vmem:[%s264_s14] ss:$0 sm:$0xff]  ;;  %p785_p2 = scmp.lt.s32.totalorder %s783_s11, %s777_s8 }
  0x21   : > { %686 = vmatpush3.bf16.msra.mxu1 %v766_v3  ;;  %p780_p0 = pneg %p779_p13 }
  0x22   : > { %687 = vmatprep.subr.bf16.mxu1 %v889_v0  ;;  %p786_p3 = por %p785_p2, %p784_p1 }
  0x24   : > { %p787_p5 = pnand %p786_p3, %p780_p0 }
  0x25   : > { %688 = vmatpush3.bf16.msra.mxu1 %v767_v5 }
  0x26   : > { %666 = vmatpush3.bf16.xpose.msra.mxu0 %v338_v4  ;;  %689 = vmatprep.subr.bf16.mxu1 %v889_v0 }
  0x27   : > { %667 = vmatprep.subr.bf16.mxu0 %v889_v0 }
  0x29   : > { %690 = vmatpush3.bf16.msra.mxu1 %v768_v6 }
  0x2a   : > { %691 = vmatprep.subr.bf16.mxu1 %v889_v0 }
  0x2d   : > { %692 = vmatpush3.bf16.msra.mxu1 %v769_v8 }
  0x2e   : > { %668 = vmatpush3.bf16.xpose.msra.mxu0 %v341_v7  ;;  %693 = vmatprep.subr.bf16.mxu1 %v889_v0 }
  0x2f   : > { %669 = vmatprep.subr.bf16.mxu0 %v889_v0 }
  0x31   : > { %694 = vmatpush3.bf16.msra.mxu1 %v770_v9 }
  0x32   : > { %695 = vmatprep.subr.bf16.mxu1 %v889_v0 }
  0x35   : > { %696 = vmatpush3.bf16.msra.mxu1 %v771_v11 }
  0x36   : > { %670 = vmatpush3.bf16.xpose.msra.mxu0 %v344_v10  ;;  %697 = vmatprep.subr.bf16.mxu1 %v889_v0 }
  0x37   : > { %671 = vmatprep.subr.bf16.mxu0 %v889_v0 }
  0x39   : > { %698 = vmatpush3.bf16.msra.mxu1 %v772_v12 }
  0x3e   : > { %672 = vmatpush3.bf16.xpose.msra.mxu0 %v347_v13 }
  0x3f   : > { %673 = vmatprep.subr.bf16.mxu0 %v889_v0 }
  0x46   : > { %674 = vmatpush3.bf16.xpose.msra.mxu0 %v350_v14 }
  0x47   : > { %675 = vmatprep.subr.bf16.mxu0 %v889_v0 }
  0x4e   : > { %676 = vmatpush3.bf16.xpose.msra.mxu0 %v353_v15 }
  0x4f   : > { %677 = vmatprep.subr.bf16.mxu0 %v889_v0 }
  0x56   : > { %678 = vmatpush3.bf16.xpose.msra.mxu0 %v356_v16 }
  0x5d   : > { %680 = vmatmul.mubr.msk.bf16.vlgmr.msra.gmra.mrb[0].mxu0 %vm330_vm1, %v266_v17 }
 0x130   : > { %v392_v19 = vpop.f32.mrb[0].mxu0 }
 0x131   : > { %v393_v20 = vadd.f32 %v628_v18, %v392_v19  ;;  %v681_v21 = vpop.f32.mrb[1].mxu0 }
 0x132   : > { %v395_v22 = vpop.f32.mrb[2].mxu0 }
 0x133   : > { %398 = vmax.xlane.f32.xlu0 %v393_v20  ;;  %v682_v23 = vpop.f32.mrb[3].mxu0 }
 0x1c0   : > { %v399_v24 = vpop.xlane.xlu0 %398 }
 0x1c1   : > { %v400_v25 = vsub.f32 %v393_v20, %v399_v24 }
 0x1c3   : > { %v401_v26 = vmul.f32 1.442695, %v400_v25 }
 0x1c5   : > { %773 = vpow2.f32 %v401_v26 }
 0x1cf   : > { %v774_v27 = vpop.eup %773 }
 0x1d0   : > { %403 = vadd.xlane.f32.xlu0 %v774_v27 }
 0x25d   : > { %v404_v28 = vpop.xlane.xlu0 %403 }
 0x25e   : > { %775 = vrcp.f32 %v404_v28 }
 0x268   : > { %v776_v29 = vpop.eup %775 }
 0x269   : > { %v407_v30 = vmul.f32 %v776_v29, %v774_v27 }
 0x26b   : > { %v408_v31 = vpack.c.bf16 %v407_v30, %v407_v30  ;;  %458 = vst [vmem:[%s249_s24] sm:$0xff] %v407_v30 }
 0x26d   : > { %700 = vmatmul.mubr.bf16.vlgmr.msra.gmra.mrb[0].mxu1 %v408_v31 }
 0x26e   : > { %790 = shalt.err (!%p787_p5)
}
 0x26f   : > { %s791_s12 = scalar_lea.hbm %s1020_s5, 128  ;;  %s795_s24 = scalar_lea.hbm %s1100_s4, 256 }
 0x270   : > { %p792_p6 = scmp.ne.s32.totalorder %s1020_s5, %s791_s12  ;;  %p796_p10 = scmp.lt.u32.totalorder %s1020_s5, %s1100_s4 }
 0x271   : > { %p797_p11 = scmp.lt.u32.totalorder %s795_s24, %s791_s12  ;;  %p799_p13 = scmp.lt.u32.totalorder %s791_s12, %s1020_s5 }
 0x272   : > { %p793_p7 = pnand %p792_p6, %p958_p4 }
 0x273   : > { %p798_p12 = por %p797_p11, %p796_p10 }
 0x274   : > { %p794_p9 = pneg %p793_p7 }
 0x275   : > { %p800_p0 = por %p799_p13, %p798_p12 }
 0x277   : > { %p801_p1 = pnand %p800_p0, %p794_p9 }
 0x279   : > { %804 = shalt.err (!%p801_p1)
}
 0x27a   : > { %704 = dma.vmem_to_hbm [thread:$0]  (%p958_p4), %s494_s6, 128, %s1020_s5, %s465_s7  }
 0x27b   : > { %s242_s8 = scalar_lea.vmem [#allocation2], %s623_s22  ;;  %s1047_s13 = scalar_lea.hbm %s1099_s3, %s640_s26 }
 0x27c   : > { %s479_s9 = sshll.u32 %s242_s8, 4  ;;  %s460_s5 = scalar_lea.sflag [#allocation3], %s1009_s21  ;;  %s1049_s9 = int_to_ptr.vmem [resolvable:$true] %s479_s9 }
 0x27d   : > { %s805_s6 = scalar_lea.vmem %s1049_s9, 128  ;;  %s892_s18 = smov [#allocation2]  }
 0x27e   : > { %p806_p2 = scmp.ne.s32.totalorder %s1049_s9, %s805_s6  ;;  %s809_s22 = sshll.u32 %s892_s18, 4  ;;  %s810_s22 = int_to_ptr.vmem [resolvable:$false] %s809_s22 }
 0x27f   : > { %s811_s26 = scalar_lea.vmem %s810_s22, 256  ;;  %p812_p6 = scmp.lt.s32.totalorder %s1049_s9, %s810_s22 }
 0x280   : > { %p807_p3 = pnand %p806_p2, %p958_p4  ;;  %p813_p7 = scmp.lt.s32.totalorder %s811_s26, %s805_s6 }
 0x282   : > { %p808_p5 = pneg %p807_p3  ;;  %p814_p9 = por %p813_p7, %p812_p6 }
 0x284   : > { %p815_p10 = pnand %p814_p9, %p808_p5 }
 0x340   : > { %v451_v32 = vpop.f32.mrb[0].mxu1 }
 0x341   : > { %457 = vst.msk [vmem:[%s242_s8] sm:$0xff] %vm330_vm1, %v451_v32  ;;  %v701_v33 = vpop.f32.mrb[1].mxu1 }
 0x342   : > { %v454_v34 = vpop.f32.mrb[2].mxu1 }
 0x343   : > { %818 = shalt.err (!%p815_p10)
}
 0x344   : > { %s819_s21 = scalar_lea.hbm %s1047_s13, 128  ;;  %s823_s14 = scalar_lea.hbm %s1099_s3, 256 }
 0x345   : > { %p820_p11 = scmp.ne.s32.totalorder %s1047_s13, %s819_s21  ;;  %p824_p0 = scmp.lt.u32.totalorder %s1047_s13, %s1099_s3 }
 0x346   : > { %p825_p1 = scmp.lt.u32.totalorder %s823_s14, %s819_s21  ;;  %p827_p3 = scmp.lt.u32.totalorder %s819_s21, %s1047_s13 }
 0x347   : > { %p821_p12 = pnand %p820_p11, %p958_p4 }
 0x348   : > { %p826_p2 = por %p825_p1, %p824_p0 }
 0x349   : > { %p822_p13 = pneg %p821_p12 }
 0x34a   : > { %p828_p5 = por %p827_p3, %p826_p2 }
 0x34c   : > { %p829_p6 = pnand %p828_p5, %p822_p13 }
 0x34e   : > { %832 = shalt.err (!%p829_p6)
}
 0x34f   : > { %703 = dma.vmem_to_hbm [thread:$0]  (%p958_p4), %s1049_s9, 128, %s1047_s13, %s460_s5   ;;  %v702_v35 = vpop.f32.mrb[3].mxu1 }
 0x350 PF: > { %p714_p7 = scmp.ge.s32.totalorder %s887_s20, 2  ;;  %s505_s30 = sand.u32 1, %s867_s15  }
 0x351   : > { %s506_s8 = scalar_lea.sflag [#allocation3], %s505_s30 }
 0x352   : > { %p708_p9 = pnand %p714_p7, %p965_p8 }
 0x354   : > { %858 = dma.done.wait (!%p708_p9), %s506_s8, 128  }
 0x355   : > { %860 = vsyncadd (!%p708_p9), %s506_s8, 4294967168  ;;  %s515_s10 = scalar_lea.sflag [#allocation5], %s505_s30 }
 0x356   : > { %862 = dma.done.wait (!%p708_p9), %s515_s10, 128  }
 0x357   : > { %864 = vsyncadd (!%p708_p9), %s515_s10, 4294967168  ;;  %s21_s20 = sadd.s32 1, %s887_s20   ;;  %s1103_s15 = smov %s871_s16 }
 0x358   : > { %p18_p10 = scmp.ge.s32.totalorder %s21_s20, 4   ;;  %s1104_s16 = smov %s875_s17 }
 0x359   : > { %s1105_s17 = smov %s971_s28  ;;  %s1106_s18 = smov %s883_s19 }
 0x35a   : > { %s1107_s19 = smov %s1109_s23  ;;  %20 = sbr.rel (!%p18_p10) target bundleno = 6 (0x6), region = 90 }
 0x361   :  { %520 = vsyncpa [#allocation3], 1 }
 0x362   :  { %522 = vsyncpa [#allocation3 + $0x1], 1 }
 0x363   :  { %523 = vsyncpa [#allocation5], 1 }
 0x364   :  { %525 = vsyncpa [#allocation5 + $0x1], 1 }

</bundles_post_ra>
